<compile_context>
chip_gen: v7x
topology: tpu7x:2x2x1
jax: 0.10.0
libtpu: 0.0.40
codegen_flags: <defaults>
</compile_context>

<pallas_src>
import jax
import jax.numpy as jnp
from jax.experimental import pallas as pl
from jax.experimental.pallas import tpu as pltpu


def _softmax_lastdim_f32(x):
    """Softmax over the last (lane) axis, computed in f32.

    The per-row divide is replaced by pl.reciprocal(approx=True) on the tiny
    (tb, tk, 1) row-sum (EUP slot), refined with one Newton step (2 VALU ops
    on the tiny tensor) back to full f32 accuracy, then a single broadcast
    multiply per element.
    """
    # TODO(synk): optional bf16 exp path for v6e/v7x EUP (2x exp throughput);
    # kept in f32 here for numerical parity with the reference on all chips.
    x = x.astype(jnp.float32)
    m = jnp.max(x, axis=-1, keepdims=True)
    e = jnp.exp(x - m)
    s = jnp.sum(e, axis=-1, keepdims=True)
    r = pl.reciprocal(s, approx=True)
    r = r * (2.0 - s * r)          # one Newton step: ~full f32 accuracy, ~free
    return e * r


def _cons_softmax_kernel(stu_ref, tea_ref, out_ref):
    """One (tb, tk, L) block: write this block's partial sum of
    (softmax(stu) - softmax(tea))**2 broadcast across 128 lanes."""
    ps = _softmax_lastdim_f32(stu_ref[...])
    pt = _softmax_lastdim_f32(tea_ref[...])
    d = ps - pt
    out_ref[...] = jnp.broadcast_to(jnp.sum(d * d), out_ref.shape)


def _vmem_limit_bytes():
    try:
        cap = int(pltpu.get_tpu_info().vmem_capacity_bytes)
    except Exception:
        cap = 64 * 1024 * 1024      # assume the smallest (v7x) if unknown
    # ~75% of physical VMEM, capped at 96 MiB: 48 MiB on v7x, 96 MiB on v5e/v6e.
    return min(cap * 3 // 4, 96 * 1024 * 1024)


def _divisors_desc(n):
    return [d for d in range(n, 0, -1) if n % d == 0]


def _pick_blocks(B, K, L, itemsize, vmem_limit):
    """Pick (tb, tk) so the per-step f32 working set fits comfortably in VMEM.

    Working set = 2 inputs x 2 double-buffers in native dtype + ~3 full-size
    f32 temporaries (ps, pt, diff), all accounted with L padded to a multiple
    of 128 lanes.  tk is dtype-aware sublane aligned (f32: 8, bf16: 16,
    int8/fp8: 32) or equal to K.
    """
    lanes = 128
    l_pad = -(-L // lanes) * lanes
    align = 8 * max(1, 4 // itemsize)

    def working_set(tb, tk):
        n = tb * tk * l_pad
        return 2 * 2 * n * itemsize + 3 * n * 4

    budget = vmem_limit // 2            # headroom for outputs / compiler scratch
    min_block = 1 << 20                 # amortize ~0.35 us per-step overhead

    k_cands = [d for d in _divisors_desc(K) if d == K or d % align == 0]
    b_cands = _divisors_desc(B)

    tb = tk = None
    for b in b_cands:                   # prefer full-B blocks: shrink K first,
        for k in k_cands:               # then shrink B (fixes the old fallback
            if working_set(b, k) <= budget:   # that ballooned to whole-K blocks)
                tb, tk = b, k
                break
        if tb is not None:
            break
    if tb is None:
        # TODO(synk): even the smallest aligned block exceeds the VMEM budget
        # (extreme B*L); an in-kernel sublane-chunked fori_loop would decouple
        # the DMA tile from the f32 working set.  Fall back to smallest block.
        tb, tk = 1, k_cands[-1]

    def steps(b, k):
        return (B // b) * (K // k)

    # If the tensor needs more than one block, aim for >= 4 grid steps so both
    # v7x TensorCores get work and DMA overlaps compute, without letting the
    # block drop below ~1 MiB of working set.
    if steps(tb, tk) > 1:
        while steps(tb, tk) < 4:
            next_k = [k for k in k_cands if k < tk and working_set(tb, k) >= min_block]
            if next_k:
                tk = next_k[0]
                continue
            next_b = [b for b in b_cands if b < tb and working_set(b, tk) >= min_block]
            if next_b:
                tb = next_b[0]
                continue
            break

    return tb, tk, l_pad


def cons_softmax_loss(stu_out, tea_out, valid_mask=None, tea_mask=None):
    """Pallas implementation of ConsSoftmaxLoss.forward (default masks only)."""
    # TODO(synk): valid_mask (data-dependent boolean indexing -> dynamic shape)
    # and tea_mask (per-(B,K) scaling) are not implemented; the module default
    # call uses None for both.
    assert valid_mask is None and tea_mask is None

    B, K, H, W = stu_out.shape
    L = H * W
    # Free reshapes, no transpose, no upcast: one HBM pass in native layout.
    stu = stu_out.reshape(B, K, L)
    tea = tea_out.reshape(B, K, L)

    itemsize = jnp.dtype(stu.dtype).itemsize
    vmem_limit = _vmem_limit_bytes()
    tb, tk, l_pad = _pick_blocks(B, K, L, itemsize, vmem_limit)
    grid_b, grid_k = B // tb, K // tk

    in_spec = pl.BlockSpec((tb, tk, L), lambda bi, ki: (bi, ki, 0))
    # Flattened (grid_b*grid_k, 1, 128) partial-sum output: every grid step
    # owns one lane-dense row (unmasked vst), no shared accumulator, so both
    # grid axes stay "parallel".
    out_spec = pl.BlockSpec((1, 1, 128), lambda bi, ki: (bi * grid_k + ki, 0, 0))

    cost = pl.CostEstimate(
        flops=12 * B * K * l_pad,                 # lane-padded compute estimate
        transcendentals=2 * B * K * l_pad,
        bytes_accessed=2 * B * K * L * itemsize + grid_b * grid_k * 128 * 4,
    )

    partials = pl.pallas_call(
        _cons_softmax_kernel,
        out_shape=jax.ShapeDtypeStruct((grid_b * grid_k, 1, 128), jnp.float32),
        grid_spec=pltpu.PrefetchScalarGridSpec(
            num_scalar_prefetch=0,
            grid=(grid_b, grid_k),
            in_specs=[in_spec, in_spec],
            out_specs=out_spec,
        ),
        compiler_params=pltpu.CompilerParams(
            dimension_semantics=("parallel", "parallel"),
            vmem_limit_bytes=vmem_limit,
        ),
        cost_estimate=cost,
    )(stu, tea)

    # mean over K, then over (B, H, W)  ==  total sum / (B*K*H*W).
    # Partials and the final re-sum stay in f32 (only grid_b*grid_k terms).
    return jnp.sum(partials[:, 0, 0]) / (B * K * H * W)


def _reference(stu, tea):
    """Pure-JAX reference mirroring the PyTorch forward (default masks)."""
    B, K, H, W = stu.shape
    ps = jax.nn.softmax(stu.reshape(B, K, -1).astype(jnp.float32), axis=-1)
    pt = jax.nn.softmax(tea.reshape(B, K, -1).astype(jnp.float32), axis=-1)
    d = ps - pt
    loss_map = jnp.mean(d * d, axis=1)   # mean over K
    return jnp.mean(loss_map)            # mean over (B, H, W)


if __name__ == "__main__":
    key = jax.random.PRNGKey(0)
    k1, k2 = jax.random.split(key)
    stu = jax.random.normal(k1, (2, 4, 16, 16), dtype=jnp.float32)
    tea = jax.random.normal(k2, (2, 4, 16, 16), dtype=jnp.float32)

    out = jax.block_until_ready(cons_softmax_loss(stu, tea))
    ref = jax.block_until_ready(_reference(stu, tea))

    assert jnp.isfinite(out), "non-finite kernel output"
    assert jnp.allclose(out, ref, rtol=1e-4, atol=1e-6), (out, ref)
    print("KERNEL_OK")
</pallas_src>

<mosaic_0001>
module attributes {stable_mosaic.version = 11 : i64} {
  func.func @_cons_softmax_kernel(%arg0: i32, %arg1: i32, %arg2: memref<2x4x256xf32, #tpu.memory_space<vmem>>, %arg3: memref<2x4x256xf32, #tpu.memory_space<vmem>>, %arg4: memref<1x1x128xf32, #tpu.memory_space<vmem>>) attributes {dimension_semantics = [#tpu.dimension_semantics<parallel>, #tpu.dimension_semantics<parallel>], iteration_bounds = array<i64: 1, 1>, scalar_prefetch = 0 : i64, scratch_operands = 0 : i64, tpu.core_type = #tpu.core_type<tc>, window_params = [{transform_indices = @transform_0, window_bounds = array<i64: 2, 4, 256>}, {transform_indices = @transform_1, window_bounds = array<i64: 2, 4, 256>}, {transform_indices = @transform_2, window_bounds = array<i64: 1, 1, 128>}]} {
    %c0 = arith.constant 0 : index
    %c0_0 = arith.constant 0 : index
    %c0_1 = arith.constant 0 : index
    %0 = vector.load %arg2[%c0, %c0_0, %c0_1] : memref<2x4x256xf32, #tpu.memory_space<vmem>>, vector<2x4x256xf32>
    %cst = arith.constant dense<0xFF800000> : vector<2x4xf32>
    %1 = vector.multi_reduction <maximumf>, %0, %cst [2] : vector<2x4x256xf32> to vector<2x4xf32>
    %2 = vector.shape_cast %1 : vector<2x4xf32> to vector<2x4x1xf32>
    %3 = vector.broadcast %2 : vector<2x4x1xf32> to vector<2x4x256xf32>
    %4 = arith.subf %0, %3 : vector<2x4x256xf32>
    %5 = math.exp %4 : vector<2x4x256xf32>
    %cst_2 = arith.constant dense<0.000000e+00> : vector<2x4xf32>
    %6 = vector.multi_reduction <add>, %5, %cst_2 [2] : vector<2x4x256xf32> to vector<2x4xf32>
    %7 = vector.shape_cast %6 : vector<2x4xf32> to vector<2x4x1xf32>
    %8 = tpu.reciprocal %7 {approx = true} : vector<2x4x1xf32> -> vector<2x4x1xf32>
    %9 = arith.mulf %7, %8 : vector<2x4x1xf32>
    %cst_3 = arith.constant 2.000000e+00 : f32
    %10 = vector.broadcast %cst_3 : f32 to vector<2x4x1xf32>
    %11 = arith.subf %10, %9 : vector<2x4x1xf32>
    %12 = arith.mulf %8, %11 : vector<2x4x1xf32>
    %13 = vector.broadcast %12 : vector<2x4x1xf32> to vector<2x4x256xf32>
    %14 = arith.mulf %5, %13 : vector<2x4x256xf32>
    %c0_4 = arith.constant 0 : index
    %c0_5 = arith.constant 0 : index
    %c0_6 = arith.constant 0 : index
    %15 = vector.load %arg3[%c0_4, %c0_5, %c0_6] : memref<2x4x256xf32, #tpu.memory_space<vmem>>, vector<2x4x256xf32>
    %cst_7 = arith.constant dense<0xFF800000> : vector<2x4xf32>
    %16 = vector.multi_reduction <maximumf>, %15, %cst_7 [2] : vector<2x4x256xf32> to vector<2x4xf32>
    %17 = vector.shape_cast %16 : vector<2x4xf32> to vector<2x4x1xf32>
    %18 = vector.broadcast %17 : vector<2x4x1xf32> to vector<2x4x256xf32>
    %19 = arith.subf %15, %18 : vector<2x4x256xf32>
    %20 = math.exp %19 : vector<2x4x256xf32>
    %cst_8 = arith.constant dense<0.000000e+00> : vector<2x4xf32>
    %21 = vector.multi_reduction <add>, %20, %cst_8 [2] : vector<2x4x256xf32> to vector<2x4xf32>
    %22 = vector.shape_cast %21 : vector<2x4xf32> to vector<2x4x1xf32>
    %23 = tpu.reciprocal %22 {approx = true} : vector<2x4x1xf32> -> vector<2x4x1xf32>
    %24 = arith.mulf %22, %23 : vector<2x4x1xf32>
    %cst_9 = arith.constant 2.000000e+00 : f32
    %25 = vector.broadcast %cst_9 : f32 to vector<2x4x1xf32>
    %26 = arith.subf %25, %24 : vector<2x4x1xf32>
    %27 = arith.mulf %23, %26 : vector<2x4x1xf32>
    %28 = vector.broadcast %27 : vector<2x4x1xf32> to vector<2x4x256xf32>
    %29 = arith.mulf %20, %28 : vector<2x4x256xf32>
    %30 = arith.subf %14, %29 : vector<2x4x256xf32>
    %31 = arith.mulf %30, %30 : vector<2x4x256xf32>
    %32 = vector.shape_cast %31 : vector<2x4x256xf32> to vector<1x2x4x256xf32>
    %cst_10 = arith.constant dense<0.000000e+00> : vector<1xf32>
    %33 = vector.multi_reduction <add>, %32, %cst_10 [1, 2, 3] : vector<1x2x4x256xf32> to vector<1xf32>
    %34 = vector.shape_cast %33 : vector<1xf32> to vector<1x1x1x1xf32>
    %35 = vector.extract %34[0, 0, 0, 0] : f32 from vector<1x1x1x1xf32>
    %36 = vector.broadcast %35 : f32 to vector<1x1x128xf32>
    %c0_11 = arith.constant 0 : index
    %c0_12 = arith.constant 0 : index
    %c0_13 = arith.constant 0 : index
    %37 = vector.load %arg4[%c0_11, %c0_12, %c0_13] : memref<1x1x128xf32, #tpu.memory_space<vmem>>, vector<1x1x128xf32>
    tpu.vector_store %arg4[%c0_11, %c0_12, %c0_13], %36 {strides = array<i32>} : memref<1x1x128xf32, #tpu.memory_space<vmem>>, vector<1x1x128xf32>,
    return
  }
  func.func @transform_0(%arg0: i32, %arg1: i32) -> (i32, i32, i32) {
    %c0_i32 = arith.constant 0 : i32
    %c0_i32_0 = arith.constant 0 : i32
    return %arg0, %arg1, %c0_i32 : i32, i32, i32
  }
  func.func @transform_1(%arg0: i32, %arg1: i32) -> (i32, i32, i32) {
    %c0_i32 = arith.constant 0 : i32
    %c0_i32_0 = arith.constant 0 : i32
    return %arg0, %arg1, %c0_i32 : i32, i32, i32
  }
  func.func @transform_2(%arg0: i32, %arg1: i32) -> (i32, i32, i32) {
    %c1_i32 = arith.constant 1 : i32
    %0 = arith.muli %arg0, %c1_i32 : i32
    %1 = arith.addi %0, %arg1 : i32
    %c0_i32 = arith.constant 0 : i32
    %c0_i32_0 = arith.constant 0 : i32
    %c0_i32_1 = arith.constant 0 : i32
    return %1, %c0_i32, %c0_i32_0 : i32, i32, i32
  }
}

</mosaic_0001>

<bundles_post_ra>
// kernel: tpu_custom_call.1
= control target key start
LH: loop header
LB: loop body
LE: loop exit
PB: predicated region body
PF: predicated region fallthrough
CT: control target
= control target key end

     0   :  { %7 = vsyncpa [#allocation3], 0  ;;  %s448_s0 = inlined_call_operand.hbm [shape: f32[2,4,256], index: 0, kind: input, shape index: {}]   ;;  %s449_s1 = inlined_call_operand.hbm [shape: f32[2,4,256], index: 1, kind: input, shape index: {}]   ;;  %s450_s2 = inlined_call_operand.hbm [shape: f32[1,1,128], index: 2, kind: output, shape index: {}]  }
   0x1   :  { %8 = vsyncpa [#allocation6], 0 }
   0x2   :  { %9 = vsyncpa [#allocation4], 0  ;;  %s361_s9 = smov [#allocation2]   ;;  %s289_s13 = scalar_lea.hbm %s448_s0, 256 }
   0x3   :  { %s15_s10 = sshll.u32 %s361_s9, 4  ;;  %p290_p0 = scmp.ne.s32.totalorder %s448_s0, %s289_s13  ;;  %s16_s10 = int_to_ptr.vmem [resolvable:$true] %s15_s10 }
   0x4   :  { %p293_p1 = scmp.lt.u32.totalorder %s289_s13, %s448_s0 }
   0x6   :  { %p295_p2 = pnand %p293_p1, %p290_p0 }
   0x8   :  { %298 = shalt.err (!%p295_p2)
}
   0x9   :  { %s299_s18 = scalar_lea.vmem %s16_s10, 256  ;;  %p304_p4 = scmp.lt.s32.totalorder %s16_s10, %s16_s10 }
   0xa   :  { %p300_p3 = scmp.ne.s32.totalorder %s16_s10, %s299_s18  ;;  %p305_p5 = scmp.lt.s32.totalorder %s299_s18, %s299_s18 }
   0xc   :  { %p306_p6 = por %p305_p5, %p304_p4 }
   0xe   :  { %p307_p7 = pnand %p306_p6, %p300_p3 }
  0x10   :  { %310 = shalt.err (!%p307_p7)
}
  0x11   :  { %s362_s19 = smov 128   ;;  %s363_s20 = smov 8  }
  0x12   :  { %21 = dma.hbm_to_vmem [thread:$0]  %s448_s0, 256, %s16_s10, [#allocation3], %s362_s19, %s362_s19, %s363_s20  }
  0x13   :  { %s364_s23 = smov [#allocation5]   ;;  %s311_s27 = scalar_lea.hbm %s449_s1, 256 }
  0x14   :  { %s27_s24 = sshll.u32 %s364_s23, 4  ;;  %p312_p8 = scmp.ne.s32.totalorder %s449_s1, %s311_s27  ;;  %s28_s24 = int_to_ptr.vmem [resolvable:$true] %s27_s24 }
  0x15   :  { %p315_p9 = scmp.lt.u32.totalorder %s311_s27, %s449_s1 }
  0x17   :  { %p317_p10 = pnand %p315_p9, %p312_p8 }
  0x19   :  { %320 = shalt.err (!%p317_p10)
}
  0x1a   :  { %s321_s4 = scalar_lea.vmem %s28_s24, 256  ;;  %p326_p12 = scmp.lt.s32.totalorder %s28_s24, %s28_s24 }
  0x1b   :  { %p322_p11 = scmp.ne.s32.totalorder %s28_s24, %s321_s4  ;;  %p327_p13 = scmp.lt.s32.totalorder %s321_s4, %s321_s4 }
  0x1d   :  { %p328_p0 = por %p327_p13, %p326_p12 }
  0x1f   :  { %p329_p1 = pnand %p328_p0, %p322_p11 }
  0x21   :  { %332 = shalt.err (!%p329_p1)
}
  0x22   :  { %33 = dma.hbm_to_vmem [thread:$0]  %s449_s1, 256, %s28_s24, [#allocation6], %s362_s19, %s362_s19, %s363_s20  }
  0x23   :  { %355 = dma.done.wait [#allocation3], 256  }
  0x24   :  { %356 = vsyncadd [#allocation3], 4294967040 }
  0x25   :  { %357 = dma.done.wait [#allocation6], 256  }
  0x26   :  { %358 = vsyncadd [#allocation6], 4294967040  ;;  %vm49_vm0 = vcmask 1043456   ;;  %v41_v0 = vld [vmem:[#allocation2] sm:$0xff]  ;;  %v42_v1 = vld [vmem:[#allocation2 + $0x8] sm:$0xff]  ;;  %v65_v22 = vlaneseq  ;;  %s366_s1 = smov [#allocation7]  }
  0x27   :  { %v128_v2 = vld [vmem:[#allocation5] sm:$0xff]  ;;  %v45_v3 = vcombine.high %v41_v0, %v41_v0  ;;  %v50_v4 = vsel %vm49_vm0, %v41_v0, -inf  ;;  %v46_v5 = vcombine.high %v42_v1, %v42_v1  ;;  %v55_v6 = vsel %vm49_vm0, %v42_v1, -inf  ;;  %v129_v7 = vld [vmem:[#allocation5 + $0x8] sm:$0xff]  ;;  %s251_s6 = sshll.u32 %s366_s1, 4  ;;  %s252_s6 = int_to_ptr.vmem [resolvable:$true] %s251_s6 }
  0x28   :  { %v132_v8 = vcombine.high %v128_v2, %v128_v2  ;;  %v133_v9 = vcombine.high %v129_v7, %v129_v7  ;;  %v136_v12 = vsel %vm49_vm0, %v128_v2, -inf  ;;  %v141_v13 = vsel %vm49_vm0, %v129_v7, -inf  ;;  %s333_s8 = scalar_lea.vmem %s252_s6, 16  ;;  %s337_s9 = scalar_lea.vmem %s252_s6, 32 }
  0x29   :  { %v51_v10 = vsel %vm49_vm0, %v45_v3, -inf  ;;  %v56_v11 = vsel %vm49_vm0, %v46_v5, -inf  ;;  %v365_v20 = vmov 839922192   ;;  %v66_v24 = vshrl.u32 %v65_v22, 7  ;;  %p334_p2 = scmp.ne.s32.totalorder %s252_s6, %s333_s8  ;;  %p338_p3 = scmp.lt.s32.totalorder %s252_s6, %s252_s6 }
  0x2a   :  { %v52_v14 = vmax.f32 %v50_v4, %v51_v10  ;;  %v57_v15 = vmax.f32 %v55_v6, %v56_v11  ;;  %v137_v16 = vsel %vm49_vm0, %v132_v8, -inf  ;;  %v142_v17 = vsel %vm49_vm0, %v133_v9, -inf  ;;  %p339_p4 = scmp.lt.s32.totalorder %s337_s9, %s333_s8 }
  0x2b   :  { %v138_v18 = vmax.f32 %v136_v12, %v137_v16  ;;  %v143_v19 = vmax.f32 %v141_v13, %v142_v17  ;;  %v63_v21 = vunpack.c.l.s4 %v365_v20 }
  0x2c   :  { %53 = vmax.xlane.f32.xlu0 %v52_v14  ;;  %58 = vmax.xlane.f32.xlu1 %v57_v15  ;;  %p340_p5 = por %p339_p4, %p338_p3 }
  0x2d   :  { %v64_v23 = vunpack.c.0.s8 %v63_v21 }
  0x2e   :  { %p341_p6 = pnand %p340_p5, %p334_p2 }
  0x2f   :  { %v414_v25 = vsub.s32 %v64_v23, %v66_v24 }
  0x30   :  { %139 = vmax.xlane.f32.xlu0 %v138_v18  ;;  %144 = vmax.xlane.f32.xlu1 %v143_v19 }
  0xb9   :  { %v54_v26 = vpop.xlane.xlu0 %53  ;;  %v59_v27 = vpop.xlane.xlu1 %58 }
  0xba   :  { %v68_v28 = vrot.slane %v54_v26, %v414_v25  ;;  %v75_v29 = vrot.slane %v59_v27, %v414_v25 }
  0xbc   :  { %v78_v30 = vsub.f32 %v41_v0, %v68_v28  ;;  %v79_v31 = vsub.f32 %v42_v1, %v75_v29 }
  0xbd   :  { %v140_v32 = vpop.xlane.xlu0 %139  ;;  %v145_v33 = vpop.xlane.xlu1 %144 }
  0xbe   :  { %v80_v34 = vmul.f32 1.442695, %v78_v30  ;;  %v82_v35 = vmul.f32 1.442695, %v79_v31  ;;  %v154_v36 = vrot.slane %v140_v32, %v414_v25  ;;  %v161_v37 = vrot.slane %v145_v33, %v414_v25 }
  0xc0   :  { %273 = vpow2.f32 %v80_v34  ;;  %v164_v38 = vsub.f32 %v128_v2, %v154_v36  ;;  %v165_v39 = vsub.f32 %v129_v7, %v161_v37 }
  0xc1   :  { %275 = vpow2.f32 %v82_v35 }
  0xc2   :  { %v166_v40 = vmul.f32 1.442695, %v164_v38  ;;  %v168_v41 = vmul.f32 1.442695, %v165_v39 }
  0xc4   :  { %277 = vpow2.f32 %v166_v40 }
  0xc5   :  { %279 = vpow2.f32 %v168_v41 }
  0xca   :  { %v274_v42 = vpop.eup %273 }
  0xcb   :  { %v276_v43 = vpop.eup %275  ;;  %v86_v44 = vcombine.high %v274_v42, %v274_v42  ;;  %v90_v46 = vsel %vm49_vm0, %v274_v42, 0.0 }
  0xcc   :  { %v87_v45 = vcombine.high %v276_v43, %v276_v43  ;;  %v95_v51 = vsel %vm49_vm0, %v276_v43, 0.0 }
  0xcd   :  { %v91_v47 = vsel %vm49_vm0, %v86_v44, 0.0 }
  0xce   :  { %v278_v48 = vpop.eup %277  ;;  %v92_v49 = vadd.f32 %v91_v47, %v90_v46  ;;  %v96_v52 = vsel %vm49_vm0, %v87_v45, 0.0 }
  0xcf   :  { %v280_v50 = vpop.eup %279  ;;  %v172_v53 = vcombine.high %v278_v48, %v278_v48  ;;  %v176_v55 = vsel %vm49_vm0, %v278_v48, 0.0  ;;  %v97_v57 = vadd.f32 %v96_v52, %v95_v51 }
  0xd0   :  { %93 = vadd.xlane.f32.xlu0 %v92_v49  ;;  %v173_v54 = vcombine.high %v280_v50, %v280_v50  ;;  %v181_v59 = vsel %vm49_vm0, %v280_v50, 0.0 }
  0xd1   :  { %v177_v56 = vsel %vm49_vm0, %v172_v53, 0.0 }
  0xd2   :  { %v178_v58 = vadd.f32 %v177_v56, %v176_v55  ;;  %v182_v60 = vsel %vm49_vm0, %v173_v54, 0.0 }
  0xd3   :  { %v183_v61 = vadd.f32 %v182_v60, %v181_v59 }
  0xd4   :  { %98 = vadd.xlane.f32.xlu0 %v97_v57  ;;  %179 = vadd.xlane.f32.xlu1 %v178_v58 }
  0xd8   :  { %184 = vadd.xlane.f32.xlu1 %v183_v61 }
 0x15d   :  { %v94_v62 = vpop.xlane.xlu0 %93 }
 0x15e   :  { %281 = vrcp.f32 %v94_v62 }
 0x161   :  { %v180_v63 = vpop.xlane.xlu1 %179  ;;  %v99_v0 = vpop.xlane.xlu0 %98 }
 0x162   :  { %283 = vrcp.f32 %v180_v63 }
 0x163   :  { %285 = vrcp.f32 %v99_v0 }
 0x165   :  { %v185_v1 = vpop.xlane.xlu1 %184 }
 0x166   :  { %287 = vrcp.f32 %v185_v1 }
 0x168   :  { %v282_v2 = vpop.eup %281 }
 0x169   :  { %v102_v3 = vmul.f32 %v282_v2, %v94_v62 }
 0x16b   :  { %v104_v4 = vsub.f32 2.0, %v102_v3 }
 0x16c   :  { %v284_v5 = vpop.eup %283 }
 0x16d   :  { %v286_v6 = vpop.eup %285  ;;  %v106_v7 = vmul.f32 %v282_v2, %v104_v4  ;;  %v188_v8 = vmul.f32 %v284_v5, %v180_v63 }
 0x16e   :  { %v103_v9 = vmul.f32 %v286_v6, %v99_v0 }
 0x16f   :  { %v190_v10 = vsub.f32 2.0, %v188_v8  ;;  %v116_v13 = vrot.slane %v106_v7, %v414_v25 }
 0x170   :  { %v288_v11 = vpop.eup %287  ;;  %v105_v12 = vsub.f32 2.0, %v103_v9 }
 0x171   :  { %v192_v14 = vmul.f32 %v284_v5, %v190_v10  ;;  %v189_v15 = vmul.f32 %v288_v11, %v185_v1  ;;  %v126_v19 = vmul.f32 %v274_v42, %v116_v13 }
 0x172   :  { %v107_v16 = vmul.f32 %v286_v6, %v105_v12 }
 0x173   :  { %v202_v17 = vrot.slane %v192_v14, %v414_v25  ;;  %v191_v18 = vsub.f32 2.0, %v189_v15 }
 0x174   :  { %v123_v21 = vrot.slane %v107_v16, %v414_v25 }
 0x175   :  { %v212_v20 = vmul.f32 %v278_v48, %v202_v17  ;;  %v193_v22 = vmul.f32 %v288_v11, %v191_v18 }
 0x176   :  { %v127_v26 = vmul.f32 %v276_v43, %v123_v21 }
 0x177   :  { %v209_v23 = vrot.slane %v193_v22, %v414_v25  ;;  %v214_v24 = vsub.f32 %v126_v19, %v212_v20 }
 0x179   :  { %v213_v27 = vmul.f32 %v280_v50, %v209_v23  ;;  %v216_v28 = vmul.f32 %v214_v24, %v214_v24 }
 0x17b   :  { %v215_v29 = vsub.f32 %v127_v26, %v213_v27  ;;  %v220_v30 = vcombine.high %v216_v28, %v216_v28  ;;  %v224_v32 = vsel %vm49_vm0, %v216_v28, 0.0 }
 0x17d   :  { %v217_v31 = vmul.f32 %v215_v29, %v215_v29  ;;  %v225_v33 = vsel %vm49_vm0, %v220_v30, 0.0 }
 0x17e   :  { %v226_v34 = vadd.f32 %v225_v33, %v224_v32 }
 0x17f   :  { %v221_v35 = vcombine.high %v217_v31, %v217_v31  ;;  %v227_v36 = vsel %vm49_vm0, %v217_v31, 0.0 }
 0x180   :  { %v228_v37 = vadd.f32 %v227_v36, %v226_v34 }
 0x181   :  { %v229_v38 = vsel %vm49_vm0, %v221_v35, 0.0 }
 0x182   :  { %v230_v39 = vadd.f32 %v229_v38, %v228_v37 }
 0x184   :  { %231 = vadd.xlane.f32.xlu0 %v230_v39 }
 0x211   :  { %v232_v25 = vpop.xlane.xlu0 %231 }
 0x212   :  { %v233_v40 = vrot.slane %v232_v25, 4 }
 0x214   :  { %v234_v41 = vadd.f32 %v233_v40, %v232_v25 }
 0x216   :  { %v235_v42 = vrot.slane %v234_v41, 2 }
 0x218   :  { %v236_v43 = vadd.f32 %v235_v42, %v234_v41 }
 0x21a   :  { %v237_v44 = vrot.slane %v236_v43, 1 }
 0x21c   :  { %v238_v45 = vadd.f32 %v237_v44, %v236_v43 }
 0x21e   :  { %261 = vpush %v238_v45 }
 0x24f   :  { %s262_s7 = spop %261 }
 0x250   :  { %v240_v46 = vstv %s262_s7 }
 0x251   :  { %241 = vst [vmem:[#allocation7] sm:$0x1] %v240_v46 }
 0x252   :  { %344 = shalt.err (!%p341_p6)
}
 0x253   :  { %s345_s12 = scalar_lea.hbm %s450_s2, 16 }
 0x254   :  { %p346_p7 = scmp.ne.s32.totalorder %s450_s2, %s345_s12  ;;  %p349_p8 = scmp.lt.u32.totalorder %s345_s12, %s450_s2 }
 0x256   :  { %p351_p9 = pnand %p349_p8, %p346_p7 }
 0x258   :  { %354 = shalt.err (!%p351_p9)
}
 0x259   :  { %254 = dma.vmem_to_hbm [thread:$0]  %s252_s6, 16, %s450_s2, [#allocation4]  }
 0x25a   :  { %359 = dma.done.wait [#allocation4], 16  }
 0x25b   :  { %360 = vsyncadd [#allocation4], 4294967280 }
 0x25c   :  { %258 = vsyncpa [#allocation3], 1 }
 0x25d   :  { %259 = vsyncpa [#allocation6], 1 }
 0x25e   :  { %260 = vsyncpa [#allocation4], 1 }

</bundles_post_ra>
